<compile_context>
chip_gen: v7x
topology: tpu7x:2x2x1
jax: 0.10.0
libtpu: 0.0.40
codegen_flags: <defaults>
</compile_context>

<pallas_src>
import functools

import jax
import jax.numpy as jnp
from jax.experimental import pallas as pl
from jax.experimental.pallas import tpu as pltpu


def _round_up(x, m):
    return (x + m - 1) // m * m


def _cdiv(a, b):
    return (a + b - 1) // b


def _gated_cnn_kernel(x_ref, halo_ref, w_ref, o_ref, *, kernel_size, pad):
    # x_ref   : (TB, TS, H)   padded-input rows [s*TS, s*TS + TS)
    # halo_ref: (TB, HB, H)   padded-input rows [(s+1)*TS, (s+1)*TS + HB)
    # w_ref   : (K*H, 2*H)    fused conv+gate weights, row index = t*H + in_ch
    # o_ref   : (TB, TS, H)
    TB, TS, H = o_ref.shape
    K = kernel_size

    x_main = x_ref[...]
    if pad > 0:
        # Window of padded rows [s*TS, s*TS + TS + 2*pad).
        window = jnp.concatenate([x_main, halo_ref[:, :2 * pad, :]], axis=1)
    else:
        window = x_main

    if K > 1:
        # Tap-concat features: contraction index = t*H + in_channel.
        feats = jnp.concatenate(
            [window[:, t:t + TS, :] for t in range(K)], axis=-1)
    else:
        feats = window
    feats = feats.reshape(TB * TS, K * H)

    # Single MXU matmul per block; f32 accumulation.
    acc = jnp.dot(feats, w_ref[...], preferred_element_type=jnp.float32)

    a = acc[:, :H]          # conv branch
    b = acc[:, H:]          # gate branch
    gated = a * jax.nn.sigmoid(b)              # f32 epilogue
    o_ref[...] = gated.reshape(TB, TS, H).astype(o_ref.dtype)


@functools.partial(
    jax.jit, static_argnames=("kernel_size", "compute_dtype", "seq_tile"))
def gated_cnn(x, w_cnn, w_gate, *, kernel_size,
              compute_dtype=jnp.bfloat16, seq_tile=256):
    """x: (B, S, H); w_*: (K, H, H) with layout w[t, in_ch, out_ch]."""
    B, S, H = x.shape
    K = kernel_size
    if K % 2 == 0:
        # PyTorch Conv1d with padding=(K-1)//2 and even K yields length S-1;
        # reject instead of silently diverging from the reference module.
        raise ValueError("gated_cnn requires an odd kernel_size")
    pad = (K - 1) // 2

    # --- tiling choices -----------------------------------------------------
    HB = max(8, _round_up(2 * pad, 8))        # halo block rows (sublane aligned)
    TS = _round_up(min(S, seq_tile), HB)      # sequence tile (multiple of HB)
    nst = _cdiv(S, TS)
    S_eff = nst * TS
    # Batch tile: aim for M = TB*TS around 256 matmul rows; TB must divide B.
    desired_tb = max(1, 256 // TS)
    TB = 1
    for d in range(min(B, desired_tb), 0, -1):
        if B % d == 0:
            TB = d
            break
    nbt = B // TB

    # --- operand prep (bf16 operands by default, f32 accumulation) -----------
    xc = x.astype(compute_dtype)
    # Padded activations: rows [pad, pad+S) hold x, everything else zero.
    # Total length nst*TS + HB so every main block and halo block is in bounds.
    Lp = S_eff + HB
    x_pad = jnp.pad(xc, ((0, 0), (pad, Lp - S - pad), (0, 0)))

    # Fused weights: (K, H, 2H) -> (K*H, 2H); first H out-cols = conv, last H = gate.
    w_cat = jnp.concatenate([w_cnn, w_gate], axis=-1)
    w_cat = w_cat.reshape(K * H, 2 * H).astype(compute_dtype)

    ratio = TS // HB   # halo block-index stride along the (padded) sequence axis

    kernel = functools.partial(_gated_cnn_kernel, kernel_size=K, pad=pad)
    out = pl.pallas_call(
        kernel,
        out_shape=jax.ShapeDtypeStruct((B, S_eff, H), x.dtype),
        grid_spec=pltpu.PrefetchScalarGridSpec(
            num_scalar_prefetch=0,
            grid=(nbt, nst),
            in_specs=[
                # main activation block
                pl.BlockSpec((TB, TS, H), lambda bt, s: (bt, s, 0)),
                # small halo view of the same padded array
                pl.BlockSpec((TB, HB, H),
                             lambda bt, s: (bt, (s + 1) * ratio, 0)),
                # fused weights, VMEM-resident across the whole grid
                pl.BlockSpec((K * H, 2 * H), lambda bt, s: (0, 0)),
            ],
            out_specs=pl.BlockSpec((TB, TS, H), lambda bt, s: (bt, s, 0)),
        ),
        compiler_params=pltpu.CompilerParams(
            dimension_semantics=("parallel", "parallel"),
            vmem_limit_bytes=48 * 1024 * 1024,  # headroom vs v7x's 64 MiB VMEM
        ),
    )(x_pad, x_pad, w_cat)

    return out[:, :S, :] if S_eff != S else out


def _reference(x, w_cnn, w_gate, kernel_size):
    """Pure-JAX reference replicating the PyTorch forward (f32)."""
    pad = (kernel_size - 1) // 2
    S = x.shape[1]
    x_pad = jnp.pad(x, ((0, 0), (pad, pad), (0, 0)))

    def conv(w):
        out = jnp.zeros(x.shape, jnp.float32)
        for t in range(kernel_size):
            out = out + jnp.einsum("bsi,io->bso", x_pad[:, t:t + S, :], w[t])
        return out

    a = conv(w_cnn)
    b = conv(w_gate)
    return a * jax.nn.sigmoid(b)


if __name__ == "__main__":
    # Small shapes consistent with the module: batch=2, seq=8, hidden=32, K=3.
    B, S, H, K = 2, 8, 32, 3

    key = jax.random.PRNGKey(0)
    kx, ka, kb = jax.random.split(key, 3)
    x = jax.random.normal(kx, (B, S, H), dtype=jnp.float32)
    # Weight layout (K, in_ch, out_ch) == PyTorch Conv1d weight (out, in, K)
    # transposed to (K, in, out).
    w_cnn = jax.random.normal(ka, (K, H, H), dtype=jnp.float32) * 0.1
    w_gate = jax.random.normal(kb, (K, H, H), dtype=jnp.float32) * 0.1

    ref = _reference(x, w_cnn, w_gate, K)

    # f32 operand path: tight check against the reference.
    out_f32 = jax.block_until_ready(
        gated_cnn(x, w_cnn, w_gate, kernel_size=K, compute_dtype=jnp.float32))
    assert out_f32.shape == (B, S, H)
    assert jnp.allclose(out_f32, ref, atol=2e-5, rtol=2e-5)

    # Default bf16 operand path (f32 accumulation): loose sanity check.
    out_bf16 = jax.block_until_ready(gated_cnn(x, w_cnn, w_gate, kernel_size=K))
    assert out_bf16.shape == (B, S, H)
    assert jnp.allclose(out_bf16, ref, atol=5e-2, rtol=5e-2)

    print("KERNEL_OK")
</pallas_src>

<mosaic_0001>
module attributes {stable_mosaic.version = 11 : i64} {
  func.func @_gated_cnn_kernel(%arg0: i32, %arg1: i32, %arg2: memref<2x8x32xf32, #tpu.memory_space<vmem>>, %arg3: memref<2x8x32xf32, #tpu.memory_space<vmem>>, %arg4: memref<96x64xf32, #tpu.memory_space<vmem>>, %arg5: memref<2x8x32xf32, #tpu.memory_space<vmem>>) attributes {dimension_semantics = [#tpu.dimension_semantics<parallel>, #tpu.dimension_semantics<parallel>], iteration_bounds = array<i64: 1, 1>, scalar_prefetch = 0 : i64, scratch_operands = 0 : i64, tpu.core_type = #tpu.core_type<tc>, window_params = [{transform_indices = @transform_0, window_bounds = array<i64: 2, 8, 32>}, {transform_indices = @transform_1, window_bounds = array<i64: 2, 8, 32>}, {pipeline_mode = #tpu.pipeline_mode<synchronous>, transform_indices = @transform_2, window_bounds = array<i64: 96, 64>}, {transform_indices = @transform_3, window_bounds = array<i64: 2, 8, 32>}]} {
    %c0 = arith.constant 0 : index
    %c0_0 = arith.constant 0 : index
    %c0_1 = arith.constant 0 : index
    %0 = vector.load %arg2[%c0, %c0_0, %c0_1] : memref<2x8x32xf32, #tpu.memory_space<vmem>>, vector<2x8x32xf32>
    %c0_2 = arith.constant 0 : index
    %c0_3 = arith.constant 0 : index
    %c0_4 = arith.constant 0 : index
    %1 = vector.load %arg3[%c0_2, %c0_3, %c0_4] : memref<2x8x32xf32, #tpu.memory_space<vmem>>, vector<2x2x32xf32>
    %2 = tpu.concatenate %0, %1 in 1 : vector<2x8x32xf32>, vector<2x2x32xf32> -> vector<2x10x32xf32>
    %3 = vector.extract_strided_slice %2 {offsets = [0, 0, 0], sizes = [2, 8, 32], strides = [1, 1, 1]} : vector<2x10x32xf32> to vector<2x8x32xf32>
    %4 = vector.extract_strided_slice %2 {offsets = [0, 1, 0], sizes = [2, 8, 32], strides = [1, 1, 1]} : vector<2x10x32xf32> to vector<2x8x32xf32>
    %5 = vector.extract_strided_slice %2 {offsets = [0, 2, 0], sizes = [2, 8, 32], strides = [1, 1, 1]} : vector<2x10x32xf32> to vector<2x8x32xf32>
    %6 = tpu.concatenate %3, %4, %5 in 2 : vector<2x8x32xf32>, vector<2x8x32xf32>, vector<2x8x32xf32> -> vector<2x8x96xf32>
    %7 = vector.shape_cast %6 : vector<2x8x96xf32> to vector<16x96xf32>
    %c0_5 = arith.constant 0 : index
    %c0_6 = arith.constant 0 : index
    %8 = vector.load %arg4[%c0_5, %c0_6] : memref<96x64xf32, #tpu.memory_space<vmem>>, vector<96x64xf32>
    %cst = arith.constant dense<0.000000e+00> : vector<16x64xf32>
    %9 = tpu.matmul %7, %8, %cst {dimension_numbers = #tpu.dot_dimension_numbers<[1], [0], [0], [1], [0, 0, 1, 1], [], []>} : vector<16x96xf32>, vector<96x64xf32>, vector<16x64xf32> -> vector<16x64xf32>
    %10 = vector.extract_strided_slice %9 {offsets = [0, 0], sizes = [16, 32], strides = [1, 1]} : vector<16x64xf32> to vector<16x32xf32>
    %11 = vector.extract_strided_slice %9 {offsets = [0, 32], sizes = [16, 32], strides = [1, 1]} : vector<16x64xf32> to vector<16x32xf32>
    %12 = arith.negf %11 : vector<16x32xf32>
    %13 = math.exp %12 : vector<16x32xf32>
    %cst_7 = arith.constant 1.000000e+00 : f32
    %14 = vector.broadcast %cst_7 : f32 to vector<16x32xf32>
    %15 = arith.addf %14, %13 : vector<16x32xf32>
    %16 = arith.divf %14, %15 : vector<16x32xf32>
    %17 = arith.mulf %10, %16 : vector<16x32xf32>
    %18 = vector.shape_cast %17 : vector<16x32xf32> to vector<2x8x32xf32>
    %c0_8 = arith.constant 0 : index
    %c0_9 = arith.constant 0 : index
    %c0_10 = arith.constant 0 : index
    %19 = vector.load %arg5[%c0_8, %c0_9, %c0_10] : memref<2x8x32xf32, #tpu.memory_space<vmem>>, vector<2x8x32xf32>
    tpu.vector_store %arg5[%c0_8, %c0_9, %c0_10], %18 {strides = array<i32>} : memref<2x8x32xf32, #tpu.memory_space<vmem>>, vector<2x8x32xf32>,
    return
  }
  func.func @transform_0(%arg0: i32, %arg1: i32) -> (i32, i32, i32) {
    %c0_i32 = arith.constant 0 : i32
    %c0_i32_0 = arith.constant 0 : i32
    return %arg0, %arg1, %c0_i32 : i32, i32, i32
  }
  func.func @transform_1(%arg0: i32, %arg1: i32) -> (i32, i32, i32) {
    %c1_i32 = arith.constant 1 : i32
    %0 = arith.addi %arg1, %c1_i32 : i32
    %c1_i32_0 = arith.constant 1 : i32
    %1 = arith.muli %0, %c1_i32_0 : i32
    %c0_i32 = arith.constant 0 : i32
    %c0_i32_1 = arith.constant 0 : i32
    return %arg0, %1, %c0_i32 : i32, i32, i32
  }
  func.func @transform_2(%arg0: i32, %arg1: i32) -> (i32, i32) {
    %c0_i32 = arith.constant 0 : i32
    %c0_i32_0 = arith.constant 0 : i32
    %c0_i32_1 = arith.constant 0 : i32
    return %c0_i32, %c0_i32_0 : i32, i32
  }
  func.func @transform_3(%arg0: i32, %arg1: i32) -> (i32, i32, i32) {
    %c0_i32 = arith.constant 0 : i32
    %c0_i32_0 = arith.constant 0 : i32
    return %arg0, %arg1, %c0_i32 : i32, i32, i32
  }
}

</mosaic_0001>

<bundles_post_ra>
// kernel: gated_cnn.1
= control target key start
LH: loop header
LB: loop body
LE: loop exit
PB: predicated region body
PF: predicated region fallthrough
CT: control target
= control target key end

     0   :  { %s481_s0 = inlined_call_operand.vmem [shape: f32[2,16,32], index: 0, kind: input, shape index: {}, may-alias: {0,1}]   ;;  %s482_s1 = inlined_call_operand.vmem [shape: f32[2,16,32], index: 1, kind: input, shape index: {}, may-alias: {0,1}]   ;;  %s483_s2 = inlined_call_operand.vmem [shape: f32[96,64], index: 2, kind: input, shape index: {}]   ;;  %s484_s3 = inlined_call_operand.hbm [shape: f32[2,8,32], index: 3, kind: output, shape index: {}]  }
   0x1   :  { %v278_v0 = vld [vmem:[%s482_s1 + $0x8] sm:$0xff]  ;;  %v279_v1 = vld [vmem:[%s482_s1 + $0x18] sm:$0xff]  ;;  %v135_v2 = vld [vmem:[%s483_s2] sm:$0xff] }
   0x2   :  { %82 = vst [vmem:[#allocation3] sm:$0xff] %v278_v0  ;;  %84 = vst [vmem:[#allocation3 + $0x8] sm:$0xff] %v279_v1  ;;  %v136_v3 = vld [vmem:[%s483_s2 + $0x8] sm:$0xff]  ;;  %v137_v4 = vld [vmem:[%s483_s2 + $0x10] sm:$0xff] }
   0x3   :  { %v138_v5 = vld [vmem:[%s483_s2 + $0x18] sm:$0xff]  ;;  %v325_v6 = vpack.c.bf16 %v136_v3, %v135_v2  ;;  %v40_v8 = vld [vmem:[%s481_s0] sm:$0xff]  ;;  %v140_v10 = vld [vmem:[%s483_s2 + $0x28] sm:$0xff] }
   0x4   :  { %v329_v7 = vpack.c.bf16 %v138_v5, %v137_v4  ;;  %v139_v9 = vld [vmem:[%s483_s2 + $0x20] sm:$0xff] }
   0x5   :  { %326 = vmatprep.subr.bf16.mxu0 %v325_v6 }
   0x6   :  { %8 = vsyncpa [#allocation5], 0  ;;  %v42_v11 = vld [vmem:[%s481_s0 + $0x10] sm:$0xff]  ;;  %328 = vmatpush3.bf16.msra.mxu0 %v325_v6  ;;  %vm103_vm0 = vcmask 1046528   ;;  %v104_v12 = vrot.slane %v40_v8, 1  ;;  %v117_v13 = vrot.slane %v40_v8, 2  ;;  %v333_v14 = vpack.c.bf16 %v140_v10, %v139_v9 }
   0x7   :  { %330 = vmatprep.subr.bf16.mxu0 %v329_v7  ;;  %vm116_vm1 = vcmask 1045504   ;;  %v141_v16 = vld [vmem:[%s483_s2 + $0x30] sm:$0xff]  ;;  %v142_v17 = vld [vmem:[%s483_s2 + $0x38] sm:$0xff]  ;;  %v107_v21 = vrot.slane %v42_v11, 1  ;;  %v120_v22 = vrot.slane %v42_v11, 2  ;;  %s387_s0 = smov 32  }
   0x8   :  { %v337_v27 = vpack.c.bf16 %v142_v17, %v141_v16  ;;  %s388_s8 = smov 64   ;;  %v143_v28 = vld [vmem:[%s483_s2 + $0x40] sm:$0xff]  ;;  %v144_v29 = vld [vmem:[%s483_s2 + $0x48] sm:$0xff]  ;;  %v145_v33 = vld [vmem:[%s483_s2 + $0x50] sm:$0xff]  ;;  %vm129_vm2 = vcmask 261120   ;;  %vm132_vm3 = vcmask 523264  }
   0x9   :  { %v97_v15 = vld [vmem:[#allocation3] sm:$0x3]  ;;  %v98_v20 = vld [vmem:[#allocation3 + $0x8] sm:$0x3]  ;;  %v341_v32 = vpack.c.bf16 %v144_v29, %v143_v28  ;;  %v146_v34 = vld [vmem:[%s483_s2 + $0x58] sm:$0xff]  ;;  %vm147_vm4 = vcmask 785408  }
   0xa   :  { %v105_v18 = vrot.slane %v97_v15, 1  ;;  %v118_v19 = vrot.slane %v97_v15, 2  ;;  %v108_v23 = vrot.slane %v98_v20, 1  ;;  %v121_v24 = vrot.slane %v98_v20, 2  ;;  %332 = vmatpush3.bf16.msra.mxu0 %v329_v7  ;;  %s389_s2 = smov 96   ;;  %s390_s17 = smov [#allocation4]  }
   0xb   :  { %334 = vmatprep.subr.bf16.mxu0 %v333_v14  ;;  %v345_v35 = vpack.c.bf16 %v146_v34, %v145_v33  ;;  %s258_s18 = sshll.u32 %s390_s17, 4  ;;  %s259_s18 = int_to_ptr.vmem [resolvable:$true] %s258_s18 }
   0xc   :  { %v106_v25 = vsel %vm103_vm0, %v104_v12, %v105_v18  ;;  %v119_v26 = vsel %vm116_vm1, %v117_v13, %v118_v19  ;;  %v109_v30 = vsel %vm103_vm0, %v107_v21, %v108_v23  ;;  %v122_v31 = vsel %vm116_vm1, %v120_v22, %v121_v24  ;;  %s363_s19 = scalar_lea.vmem %s259_s18, 256  ;;  %p368_p1 = scmp.lt.s32.totalorder %s259_s18, %s259_s18 }
   0xd   :  { %110 = vrot.lane.b32.xlu0 %v106_v25, %s387_s0  ;;  %123 = vrot.lane.b32.xlu1 %v119_v26, %s388_s8  ;;  %p364_p0 = scmp.ne.s32.totalorder %s259_s18, %s363_s19  ;;  %p369_p2 = scmp.lt.s32.totalorder %s363_s19, %s363_s19 }
   0xe   :  { %336 = vmatpush3.bf16.msra.mxu0 %v333_v14 }
   0xf   :  { %338 = vmatprep.subr.bf16.mxu0 %v337_v27  ;;  %p370_p3 = por %p369_p2, %p368_p1 }
  0x11   :  { %112 = vrot.lane.b32.xlu0 %v109_v30, %s387_s0  ;;  %125 = vrot.lane.b32.xlu1 %v122_v31, %s388_s8  ;;  %p371_p4 = pnand %p370_p3, %p364_p0 }
  0x12   :  { %340 = vmatpush3.bf16.msra.mxu0 %v337_v27 }
  0x13   :  { %342 = vmatprep.subr.bf16.mxu0 %v341_v32 }
  0x16   :  { %344 = vmatpush3.bf16.msra.mxu0 %v341_v32 }
  0x17   :  { %346 = vmatprep.subr.bf16.mxu0 %v345_v35 }
  0x1a   :  { %348 = vmatpush3.bf16.msra.mxu0 %v345_v35 }
  0x7f   :  { %v111_v36 = vpop.permute.xlu0 %110  ;;  %v124_v37 = vpop.permute.xlu1 %123 }
  0x80   :  { %v130_v38 = vsel %vm129_vm2, %v40_v8, %v111_v36 }
  0x81   :  { %v133_v39 = vsel %vm132_vm3, %v130_v38, %v124_v37 }
  0x82   :  { %322 = vmatprep.mubr.msk.f32.mxu0 %vm147_vm4, %v133_v39 }
  0x83   :  { %v113_v40 = vpop.permute.xlu0 %112  ;;  %v126_v41 = vpop.permute.xlu1 %125 }
  0x84   :  { %v131_v42 = vsel %vm129_vm2, %v42_v11, %v113_v40 }
  0x85   :  { %v134_v43 = vsel %vm132_vm3, %v131_v42, %v126_v41 }
  0x86   :  { %323 = vmatmul.mubr.msk.f32.vlgmr.msra.gmra.mrb[0].mxu0 %vm147_vm4, %v134_v43 }
 0x159   :  { %v324_v44 = vpop.f32.mrb[0].mxu0 }
 0x15a   :  { %v283_v45 = vmul.f32 -1.442695, %v324_v44  ;;  %v220_v46 = vpop.f32.mrb[1].mxu0 }
 0x15b   :  { %v282_v47 = vmul.f32 -1.442695, %v220_v46 }
 0x15c   :  { %355 = vpow2.f32 %v283_v45 }
 0x15d   :  { %357 = vpow2.f32 %v282_v47 }
 0x166   :  { %v356_v48 = vpop.eup %355 }
 0x167   :  { %v358_v49 = vpop.eup %357  ;;  %v236_v50 = vadd.f32 1.0, %v356_v48 }
 0x168   :  { %v235_v51 = vadd.f32 1.0, %v358_v49 }
 0x169   :  { %359 = vrcp.f32 %v236_v50 }
 0x16a   :  { %361 = vrcp.f32 %v235_v51 }
 0x173   :  { %v360_v52 = vpop.eup %359 }
 0x174   :  { %v362_v53 = vpop.eup %361  ;;  %245 = vrot.lane.b32.xlu1 %v360_v52, %s389_s2 }
 0x175   :  { %243 = vrot.lane.b32.xlu0 %v362_v53, %s389_s2 }
 0x1e6   :  { %v246_v54 = vpop.permute.xlu1 %245 }
 0x1e7   :  { %v250_v55 = vmul.f32 %v324_v44, %v246_v54  ;;  %v244_v56 = vpop.permute.xlu0 %243 }
 0x1e8   :  { %v249_v57 = vmul.f32 %v244_v56, %v220_v46 }
 0x1e9   :  { %252 = vst.msk [vmem:[#allocation4 + $0x8] sm:$0xff] %vm129_vm2, %v250_v55 }
 0x1ea   :  { %251 = vst.msk [vmem:[#allocation4] sm:$0xff] %vm129_vm2, %v249_v57 }
 0x1eb   :  { %374 = shalt.err (!%p371_p4)
}
 0x1ec   :  { %s375_s22 = scalar_lea.hbm %s484_s3, 256 }
 0x1ed   :  { %p376_p5 = scmp.ne.s32.totalorder %s484_s3, %s375_s22  ;;  %p379_p6 = scmp.lt.u32.totalorder %s375_s22, %s484_s3 }
 0x1ef   :  { %p381_p7 = pnand %p379_p6, %p376_p5 }
 0x1f1   :  { %384 = shalt.err (!%p381_p7)
}
 0x1f2   :  { %s391_s26 = smov 128   ;;  %s392_s27 = smov 8  }
 0x1f3   :  { %264 = dma.vmem_to_hbm [thread:$0]  %s259_s18, 256, %s484_s3, [#allocation5], %s391_s26, %s391_s26, %s392_s27  }
 0x1f4   :  { %385 = dma.done.wait [#allocation5], 256  }
 0x1f5   :  { %386 = vsyncadd [#allocation5], 4294967040 }
 0x1f6   :  { %268 = vsyncpa [#allocation5], 1 }

</bundles_post_ra>
